<compile_context>
chip_gen: v5e
topology: v5e:2x2
jax: 0.10.0
libtpu: 0.0.40
codegen_flags: <defaults>
</compile_context>

<pallas_src>
import jax
import jax.numpy as jnp
from jax.experimental import pallas as pl
from jax.experimental.pallas import tpu as pltpu

# ---- model configuration (from M.head_size = [[2], [1], [2]]) ----
HEAD_SIZE = [[2], [1], [2]]
NUM_CLASS = sum(sum(HEAD_SIZE, []))          # 5
HEAD_OFF = [2, 3, 5]                         # np.cumsum([sum(h) for h in head_size])
N_JTYP = 1

C_IN = 4                                     # backbone input channels
C_FEAT = 8                                   # backbone feature channels
C_TOT = C_FEAT + 1 + 2                       # 11 fused output channels [feat|jmap|joff]

# Per-grid-step double-buffered working-set budget (bytes): input (C_IN ch) +
# outputs (C_TOT ch), f32, x2 buffers.  8 MiB keeps full double-buffering well
# inside v5e's 16 MiB scoped default and v7x's 64 MiB physical VMEM while
# amortizing the ~0.35 us per-step overhead (tiles of ~30K-70K pixels).
VMEM_TILE_BUDGET = 8 * 1024 * 1024


def _pick_tile_h(H, W):
    """Pick row tile TH and padded height Hp for the (TH, W) pixel tiles."""
    bytes_per_row = (C_IN + C_TOT) * W * 4 * 2        # f32, double-buffered
    max_rows = max(8, VMEM_TILE_BUDGET // bytes_per_row)
    if H <= max_rows:
        return H, H                                   # full-height block (full dim OK)
    Hp = ((H + 7) // 8) * 8                           # pad so TH can be a multiple of 8
    best = 8
    th = 8
    while th <= max_rows:
        if Hp % th == 0:
            best = th
        th += 8
    return best, Hp


def _multitask_kernel(w_ref, b_ref, x_ref, feat_ref, jmap_ref, joff_ref):
    """Fused 1x1-conv backbone + LCNN head for one (TH, W) row tile of one image.

    w_ref    : SMEM (C_TOT, C_IN)  fused weights, rows [0:8]=feat, [8]=jmap diff, [9:11]=joff
    b_ref    : SMEM (C_TOT,)       fused bias
    x_ref    : VMEM (C_IN, TH, W)  input pixels (W on lanes, TH on sublanes)
    feat_ref : VMEM (C_FEAT, TH, W)
    jmap_ref : VMEM (1, TH, W)
    joff_ref : VMEM (2, TH, W)
    """
    xs = [x_ref[c] for c in range(C_IN)]              # four lane-dense (TH, W) slabs

    def conv_row(j):
        # 1x1 conv output channel j as unrolled VPU broadcast-FMAs (K=4 is far too
        # small for the MXU; keeps the MXU feed/pop path out of a mem-bound kernel).
        acc = xs[0] * w_ref[j, 0] + b_ref[j]
        for c in range(1, C_IN):
            acc = acc + xs[c] * w_ref[j, c]
        return acc

    # feature channels (bulk of the output bytes) — full-width unmasked stores
    for j in range(C_FEAT):
        feat_ref[j] = conv_row(j)

    # jmap: softmax([l0, l1])[1] == sigmoid(l1 - l0); the (w1-w0, b1-b0) fold is
    # done once in the wrapper, so this is a single EUP sigmoid per pixel.
    jmap_ref[0] = jax.nn.sigmoid(conv_row(C_FEAT))

    # joff: sigmoid - 0.5
    joff_ref[0] = jax.nn.sigmoid(conv_row(C_FEAT + 1)) - 0.5
    joff_ref[1] = jax.nn.sigmoid(conv_row(C_FEAT + 2)) - 0.5


def multitask_learner_forward(image, w_head, b_head, w_feat, b_feat):
    """image: (B, C_IN, H, W) NCHW float32.  Returns dict like the PyTorch module."""
    B, C, H, W = image.shape
    assert C == C_IN

    TH, Hp = _pick_tile_h(H, W)
    assert Hp % TH == 0

    x = image
    if Hp != H:
        # Pad rows up to the tile multiple; padded rows are sliced off below.
        x = jnp.pad(image, ((0, 0), (0, 0), (0, Hp - H), (0, 0)))

    # Fused per-pixel channel weights, row order [feature(8), jmap(1), joff(2)].
    # The dead lmap channel (HEAD_OFF[0]:HEAD_OFF[1]) is dropped (unused by forward).
    w_jmap = (w_head[:, 1] - w_head[:, 0])[:, None]                  # (C_IN, 1)
    b_jmap = (b_head[1] - b_head[0]).reshape(1)                      # (1,)
    w_all = jnp.concatenate([w_feat, w_jmap, w_head[:, 3:5]], axis=1).T   # (C_TOT, C_IN)
    b_all = jnp.concatenate([b_feat, b_jmap, b_head[3:5]])                # (C_TOT,)

    grid = (B, Hp // TH)
    feat, jmap, joff = pl.pallas_call(
        _multitask_kernel,
        out_shape=(
            jax.ShapeDtypeStruct((B, C_FEAT, Hp, W), jnp.float32),
            jax.ShapeDtypeStruct((B, 1, Hp, W), jnp.float32),
            jax.ShapeDtypeStruct((B, 2, Hp, W), jnp.float32),
        ),
        grid_spec=pltpu.PrefetchScalarGridSpec(
            num_scalar_prefetch=0,
            grid=grid,
            in_specs=[
                pl.BlockSpec(memory_space=pltpu.MemorySpace.SMEM),    # w_all (scalars)
                pl.BlockSpec(memory_space=pltpu.MemorySpace.SMEM),    # b_all (scalars)
                pl.BlockSpec((None, C_IN, TH, W), lambda b, h: (b, 0, h, 0)),
            ],
            out_specs=[
                pl.BlockSpec((None, C_FEAT, TH, W), lambda b, h: (b, 0, h, 0)),
                pl.BlockSpec((None, 1, TH, W), lambda b, h: (b, 0, h, 0)),
                pl.BlockSpec((None, 2, TH, W), lambda b, h: (b, 0, h, 0)),
            ],
        ),
        compiler_params=pltpu.CompilerParams(
            dimension_semantics=("parallel", "parallel"),
            vmem_limit_bytes=32 * 1024 * 1024),
    )(w_all, b_all, x)

    if Hp != H:
        feat = feat[:, :, :H, :]
        jmap = jmap[:, :, :H, :]
        joff = joff[:, :, :H, :]

    # PyTorch shapes: only major-dim reshapes (minor (H, W) untouched -> no relayout).
    return {
        "feature": feat,                                   # (B, C_FEAT, H, W)
        "preds": {
            "jmap": jmap,                                  # (B, n_jtyp, H, W)
            "joff": joff.reshape(B, N_JTYP, 2, H, W),      # (B, n_jtyp, 2, H, W)
        },
    }


def _reference(image, w_head, b_head, w_feat, b_feat):
    """Pure-JAX transcription of the PyTorch forward (with the synthetic backbone)."""
    outputs0 = jnp.einsum("bchw,co->bohw", image, w_head) + b_head[None, :, None, None]
    feature = jnp.einsum("bchw,co->bohw", image, w_feat) + b_feat[None, :, None, None]
    B, _, H, W = outputs0.shape
    output = jnp.transpose(outputs0, (1, 0, 2, 3))                 # transpose(0,1); reshape(-1,B,H,W)
    jmap = output[0:HEAD_OFF[0]].reshape(N_JTYP, 2, B, H, W)
    joff = output[HEAD_OFF[1]:HEAD_OFF[2]].reshape(N_JTYP, 2, B, H, W)
    jmap_p = jax.nn.softmax(jnp.transpose(jmap, (2, 0, 1, 3, 4)), axis=2)[:, :, 1]
    joff_p = jax.nn.sigmoid(jnp.transpose(joff, (2, 0, 1, 3, 4))) - 0.5
    return {"feature": feature, "preds": {"jmap": jmap_p, "joff": joff_p}}


if __name__ == "__main__":
    key = jax.random.PRNGKey(0)
    k_img, k_wh, k_bh, k_wf, k_bf = jax.random.split(key, 5)

    B, H, W = 2, 16, 16
    image = jax.random.normal(k_img, (B, C_IN, H, W), dtype=jnp.float32)

    # deterministic synthetic backbone parameters (1x1 convs)
    w_head = jax.random.normal(k_wh, (C_IN, NUM_CLASS), dtype=jnp.float32) * 0.2
    b_head = jax.random.normal(k_bh, (NUM_CLASS,), dtype=jnp.float32) * 0.1
    w_feat = jax.random.normal(k_wf, (C_IN, C_FEAT), dtype=jnp.float32) * 0.2
    b_feat = jax.random.normal(k_bf, (C_FEAT,), dtype=jnp.float32) * 0.1

    result = multitask_learner_forward(image, w_head, b_head, w_feat, b_feat)
    jax.block_until_ready(result)

    ref = _reference(image, w_head, b_head, w_feat, b_feat)

    assert result["preds"]["jmap"].shape == (B, N_JTYP, H, W)
    assert result["preds"]["joff"].shape == (B, N_JTYP, 2, H, W)
    assert result["feature"].shape == (B, C_FEAT, H, W)
    assert jnp.allclose(result["preds"]["jmap"], ref["preds"]["jmap"], atol=1e-5)
    assert jnp.allclose(result["preds"]["joff"], ref["preds"]["joff"], atol=1e-5)
    assert jnp.allclose(result["feature"], ref["feature"], atol=1e-5)

    print("KERNEL_OK")
</pallas_src>

<mosaic_0001>
module attributes {stable_mosaic.version = 11 : i64} {
  func.func @_multitask_kernel(%arg0: i32, %arg1: i32, %arg2: memref<11x4xf32, #tpu.memory_space<smem>>, %arg3: memref<11xf32, #tpu.memory_space<smem>>, %arg4: memref<1x4x16x16xf32, #tpu.memory_space<vmem>>, %arg5: memref<1x8x16x16xf32, #tpu.memory_space<vmem>>, %arg6: memref<1x1x16x16xf32, #tpu.memory_space<vmem>>, %arg7: memref<1x2x16x16xf32, #tpu.memory_space<vmem>>) attributes {dimension_semantics = [#tpu.dimension_semantics<parallel>, #tpu.dimension_semantics<parallel>], iteration_bounds = array<i64: 2, 1>, scalar_prefetch = 0 : i64, scratch_operands = 0 : i64, tpu.core_type = #tpu.core_type<tc>, window_params = [{transform_indices = @transform_0, window_bounds = array<i64: 11, 4>}, {transform_indices = @transform_1, window_bounds = array<i64: 11>}, {transform_indices = @transform_2, window_bounds = array<i64: 1, 4, 16, 16>}, {transform_indices = @transform_3, window_bounds = array<i64: 1, 8, 16, 16>}, {transform_indices = @transform_4, window_bounds = array<i64: 1, 1, 16, 16>}, {transform_indices = @transform_5, window_bounds = array<i64: 1, 2, 16, 16>}]} {
    %c0 = arith.constant 0 : index
    %c0_0 = arith.constant 0 : index
    %c0_1 = arith.constant 0 : index
    %c0_2 = arith.constant 0 : index
    %0 = vector.load %arg4[%c0, %c0_0, %c0_1, %c0_2] : memref<1x4x16x16xf32, #tpu.memory_space<vmem>>, vector<1x1x16x16xf32>
    %1 = vector.shape_cast %0 : vector<1x1x16x16xf32> to vector<16x16xf32>
    %c0_3 = arith.constant 0 : index
    %c1 = arith.constant 1 : index
    %c0_4 = arith.constant 0 : index
    %c0_5 = arith.constant 0 : index
    %2 = vector.load %arg4[%c0_3, %c1, %c0_4, %c0_5] : memref<1x4x16x16xf32, #tpu.memory_space<vmem>>, vector<1x1x16x16xf32>
    %3 = vector.shape_cast %2 : vector<1x1x16x16xf32> to vector<16x16xf32>
    %c0_6 = arith.constant 0 : index
    %c2 = arith.constant 2 : index
    %c0_7 = arith.constant 0 : index
    %c0_8 = arith.constant 0 : index
    %4 = vector.load %arg4[%c0_6, %c2, %c0_7, %c0_8] : memref<1x4x16x16xf32, #tpu.memory_space<vmem>>, vector<1x1x16x16xf32>
    %5 = vector.shape_cast %4 : vector<1x1x16x16xf32> to vector<16x16xf32>
    %c0_9 = arith.constant 0 : index
    %c3 = arith.constant 3 : index
    %c0_10 = arith.constant 0 : index
    %c0_11 = arith.constant 0 : index
    %6 = vector.load %arg4[%c0_9, %c3, %c0_10, %c0_11] : memref<1x4x16x16xf32, #tpu.memory_space<vmem>>, vector<1x1x16x16xf32>
    %7 = vector.shape_cast %6 : vector<1x1x16x16xf32> to vector<16x16xf32>
    %c0_12 = arith.constant 0 : index
    %c0_13 = arith.constant 0 : index
    %8 = memref.load %arg2[%c0_12, %c0_13] : memref<11x4xf32, #tpu.memory_space<smem>>
    %9 = vector.broadcast %8 : f32 to vector<16x16xf32>
    %10 = arith.mulf %1, %9 : vector<16x16xf32>
    %c0_14 = arith.constant 0 : index
    %11 = memref.load %arg3[%c0_14] : memref<11xf32, #tpu.memory_space<smem>>
    %12 = vector.broadcast %11 : f32 to vector<16x16xf32>
    %13 = arith.addf %10, %12 : vector<16x16xf32>
    %c0_15 = arith.constant 0 : index
    %c1_16 = arith.constant 1 : index
    %14 = memref.load %arg2[%c0_15, %c1_16] : memref<11x4xf32, #tpu.memory_space<smem>>
    %15 = vector.broadcast %14 : f32 to vector<16x16xf32>
    %16 = arith.mulf %3, %15 : vector<16x16xf32>
    %17 = arith.addf %13, %16 : vector<16x16xf32>
    %c0_17 = arith.constant 0 : index
    %c2_18 = arith.constant 2 : index
    %18 = memref.load %arg2[%c0_17, %c2_18] : memref<11x4xf32, #tpu.memory_space<smem>>
    %19 = vector.broadcast %18 : f32 to vector<16x16xf32>
    %20 = arith.mulf %5, %19 : vector<16x16xf32>
    %21 = arith.addf %17, %20 : vector<16x16xf32>
    %c0_19 = arith.constant 0 : index
    %c3_20 = arith.constant 3 : index
    %22 = memref.load %arg2[%c0_19, %c3_20] : memref<11x4xf32, #tpu.memory_space<smem>>
    %23 = vector.broadcast %22 : f32 to vector<16x16xf32>
    %24 = arith.mulf %7, %23 : vector<16x16xf32>
    %25 = arith.addf %21, %24 : vector<16x16xf32>
    %c0_21 = arith.constant 0 : index
    %c0_22 = arith.constant 0 : index
    %c0_23 = arith.constant 0 : index
    %c0_24 = arith.constant 0 : index
    %26 = vector.load %arg5[%c0_21, %c0_22, %c0_23, %c0_24] : memref<1x8x16x16xf32, #tpu.memory_space<vmem>>, vector<1x1x16x16xf32>
    %27 = vector.shape_cast %26 : vector<1x1x16x16xf32> to vector<16x16xf32>
    %28 = vector.shape_cast %25 : vector<16x16xf32> to vector<1x1x16x16xf32>
    tpu.vector_store %arg5[%c0_21, %c0_22, %c0_23, %c0_24], %28 {strides = array<i32>} : memref<1x8x16x16xf32, #tpu.memory_space<vmem>>, vector<1x1x16x16xf32>,
    %c1_25 = arith.constant 1 : index
    %c0_26 = arith.constant 0 : index
    %29 = memref.load %arg2[%c1_25, %c0_26] : memref<11x4xf32, #tpu.memory_space<smem>>
    %30 = vector.broadcast %29 : f32 to vector<16x16xf32>
    %31 = arith.mulf %1, %30 : vector<16x16xf32>
    %c1_27 = arith.constant 1 : index
    %32 = memref.load %arg3[%c1_27] : memref<11xf32, #tpu.memory_space<smem>>
    %33 = vector.broadcast %32 : f32 to vector<16x16xf32>
    %34 = arith.addf %31, %33 : vector<16x16xf32>
    %c1_28 = arith.constant 1 : index
    %c1_29 = arith.constant 1 : index
    %35 = memref.load %arg2[%c1_28, %c1_29] : memref<11x4xf32, #tpu.memory_space<smem>>
    %36 = vector.broadcast %35 : f32 to vector<16x16xf32>
    %37 = arith.mulf %3, %36 : vector<16x16xf32>
    %38 = arith.addf %34, %37 : vector<16x16xf32>
    %c1_30 = arith.constant 1 : index
    %c2_31 = arith.constant 2 : index
    %39 = memref.load %arg2[%c1_30, %c2_31] : memref<11x4xf32, #tpu.memory_space<smem>>
    %40 = vector.broadcast %39 : f32 to vector<16x16xf32>
    %41 = arith.mulf %5, %40 : vector<16x16xf32>
    %42 = arith.addf %38, %41 : vector<16x16xf32>
    %c1_32 = arith.constant 1 : index
    %c3_33 = arith.constant 3 : index
    %43 = memref.load %arg2[%c1_32, %c3_33] : memref<11x4xf32, #tpu.memory_space<smem>>
    %44 = vector.broadcast %43 : f32 to vector<16x16xf32>
    %45 = arith.mulf %7, %44 : vector<16x16xf32>
    %46 = arith.addf %42, %45 : vector<16x16xf32>
    %c0_34 = arith.constant 0 : index
    %c1_35 = arith.constant 1 : index
    %c0_36 = arith.constant 0 : index
    %c0_37 = arith.constant 0 : index
    %47 = vector.load %arg5[%c0_34, %c1_35, %c0_36, %c0_37] : memref<1x8x16x16xf32, #tpu.memory_space<vmem>>, vector<1x1x16x16xf32>
    %48 = vector.shape_cast %47 : vector<1x1x16x16xf32> to vector<16x16xf32>
    %49 = vector.shape_cast %46 : vector<16x16xf32> to vector<1x1x16x16xf32>
    tpu.vector_store %arg5[%c0_34, %c1_35, %c0_36, %c0_37], %49 {strides = array<i32>} : memref<1x8x16x16xf32, #tpu.memory_space<vmem>>, vector<1x1x16x16xf32>,
    %c2_38 = arith.constant 2 : index
    %c0_39 = arith.constant 0 : index
    %50 = memref.load %arg2[%c2_38, %c0_39] : memref<11x4xf32, #tpu.memory_space<smem>>
    %51 = vector.broadcast %50 : f32 to vector<16x16xf32>
    %52 = arith.mulf %1, %51 : vector<16x16xf32>
    %c2_40 = arith.constant 2 : index
    %53 = memref.load %arg3[%c2_40] : memref<11xf32, #tpu.memory_space<smem>>
    %54 = vector.broadcast %53 : f32 to vector<16x16xf32>
    %55 = arith.addf %52, %54 : vector<16x16xf32>
    %c2_41 = arith.constant 2 : index
    %c1_42 = arith.constant 1 : index
    %56 = memref.load %arg2[%c2_41, %c1_42] : memref<11x4xf32, #tpu.memory_space<smem>>
    %57 = vector.broadcast %56 : f32 to vector<16x16xf32>
    %58 = arith.mulf %3, %57 : vector<16x16xf32>
    %59 = arith.addf %55, %58 : vector<16x16xf32>
    %c2_43 = arith.constant 2 : index
    %c2_44 = arith.constant 2 : index
    %60 = memref.load %arg2[%c2_43, %c2_44] : memref<11x4xf32, #tpu.memory_space<smem>>
    %61 = vector.broadcast %60 : f32 to vector<16x16xf32>
    %62 = arith.mulf %5, %61 : vector<16x16xf32>
    %63 = arith.addf %59, %62 : vector<16x16xf32>
    %c2_45 = arith.constant 2 : index
    %c3_46 = arith.constant 3 : index
    %64 = memref.load %arg2[%c2_45, %c3_46] : memref<11x4xf32, #tpu.memory_space<smem>>
    %65 = vector.broadcast %64 : f32 to vector<16x16xf32>
    %66 = arith.mulf %7, %65 : vector<16x16xf32>
    %67 = arith.addf %63, %66 : vector<16x16xf32>
    %c0_47 = arith.constant 0 : index
    %c2_48 = arith.constant 2 : index
    %c0_49 = arith.constant 0 : index
    %c0_50 = arith.constant 0 : index
    %68 = vector.load %arg5[%c0_47, %c2_48, %c0_49, %c0_50] : memref<1x8x16x16xf32, #tpu.memory_space<vmem>>, vector<1x1x16x16xf32>
    %69 = vector.shape_cast %68 : vector<1x1x16x16xf32> to vector<16x16xf32>
    %70 = vector.shape_cast %67 : vector<16x16xf32> to vector<1x1x16x16xf32>
    tpu.vector_store %arg5[%c0_47, %c2_48, %c0_49, %c0_50], %70 {strides = array<i32>} : memref<1x8x16x16xf32, #tpu.memory_space<vmem>>, vector<1x1x16x16xf32>,
    %c3_51 = arith.constant 3 : index
    %c0_52 = arith.constant 0 : index
    %71 = memref.load %arg2[%c3_51, %c0_52] : memref<11x4xf32, #tpu.memory_space<smem>>
    %72 = vector.broadcast %71 : f32 to vector<16x16xf32>
    %73 = arith.mulf %1, %72 : vector<16x16xf32>
    %c3_53 = arith.constant 3 : index
    %74 = memref.load %arg3[%c3_53] : memref<11xf32, #tpu.memory_space<smem>>
    %75 = vector.broadcast %74 : f32 to vector<16x16xf32>
    %76 = arith.addf %73, %75 : vector<16x16xf32>
    %c3_54 = arith.constant 3 : index
    %c1_55 = arith.constant 1 : index
    %77 = memref.load %arg2[%c3_54, %c1_55] : memref<11x4xf32, #tpu.memory_space<smem>>
    %78 = vector.broadcast %77 : f32 to vector<16x16xf32>
    %79 = arith.mulf %3, %78 : vector<16x16xf32>
    %80 = arith.addf %76, %79 : vector<16x16xf32>
    %c3_56 = arith.constant 3 : index
    %c2_57 = arith.constant 2 : index
    %81 = memref.load %arg2[%c3_56, %c2_57] : memref<11x4xf32, #tpu.memory_space<smem>>
    %82 = vector.broadcast %81 : f32 to vector<16x16xf32>
    %83 = arith.mulf %5, %82 : vector<16x16xf32>
    %84 = arith.addf %80, %83 : vector<16x16xf32>
    %c3_58 = arith.constant 3 : index
    %c3_59 = arith.constant 3 : index
    %85 = memref.load %arg2[%c3_58, %c3_59] : memref<11x4xf32, #tpu.memory_space<smem>>
    %86 = vector.broadcast %85 : f32 to vector<16x16xf32>
    %87 = arith.mulf %7, %86 : vector<16x16xf32>
    %88 = arith.addf %84, %87 : vector<16x16xf32>
    %c0_60 = arith.constant 0 : index
    %c3_61 = arith.constant 3 : index
    %c0_62 = arith.constant 0 : index
    %c0_63 = arith.constant 0 : index
    %89 = vector.load %arg5[%c0_60, %c3_61, %c0_62, %c0_63] : memref<1x8x16x16xf32, #tpu.memory_space<vmem>>, vector<1x1x16x16xf32>
    %90 = vector.shape_cast %89 : vector<1x1x16x16xf32> to vector<16x16xf32>
    %91 = vector.shape_cast %88 : vector<16x16xf32> to vector<1x1x16x16xf32>
    tpu.vector_store %arg5[%c0_60, %c3_61, %c0_62, %c0_63], %91 {strides = array<i32>} : memref<1x8x16x16xf32, #tpu.memory_space<vmem>>, vector<1x1x16x16xf32>,
    %c4 = arith.constant 4 : index
    %c0_64 = arith.constant 0 : index
    %92 = memref.load %arg2[%c4, %c0_64] : memref<11x4xf32, #tpu.memory_space<smem>>
    %93 = vector.broadcast %92 : f32 to vector<16x16xf32>
    %94 = arith.mulf %1, %93 : vector<16x16xf32>
    %c4_65 = arith.constant 4 : index
    %95 = memref.load %arg3[%c4_65] : memref<11xf32, #tpu.memory_space<smem>>
    %96 = vector.broadcast %95 : f32 to vector<16x16xf32>
    %97 = arith.addf %94, %96 : vector<16x16xf32>
    %c4_66 = arith.constant 4 : index
    %c1_67 = arith.constant 1 : index
    %98 = memref.load %arg2[%c4_66, %c1_67] : memref<11x4xf32, #tpu.memory_space<smem>>
    %99 = vector.broadcast %98 : f32 to vector<16x16xf32>
    %100 = arith.mulf %3, %99 : vector<16x16xf32>
    %101 = arith.addf %97, %100 : vector<16x16xf32>
    %c4_68 = arith.constant 4 : index
    %c2_69 = arith.constant 2 : index
    %102 = memref.load %arg2[%c4_68, %c2_69] : memref<11x4xf32, #tpu.memory_space<smem>>
    %103 = vector.broadcast %102 : f32 to vector<16x16xf32>
    %104 = arith.mulf %5, %103 : vector<16x16xf32>
    %105 = arith.addf %101, %104 : vector<16x16xf32>
    %c4_70 = arith.constant 4 : index
    %c3_71 = arith.constant 3 : index
    %106 = memref.load %arg2[%c4_70, %c3_71] : memref<11x4xf32, #tpu.memory_space<smem>>
    %107 = vector.broadcast %106 : f32 to vector<16x16xf32>
    %108 = arith.mulf %7, %107 : vector<16x16xf32>
    %109 = arith.addf %105, %108 : vector<16x16xf32>
    %c0_72 = arith.constant 0 : index
    %c4_73 = arith.constant 4 : index
    %c0_74 = arith.constant 0 : index
    %c0_75 = arith.constant 0 : index
    %110 = vector.load %arg5[%c0_72, %c4_73, %c0_74, %c0_75] : memref<1x8x16x16xf32, #tpu.memory_space<vmem>>, vector<1x1x16x16xf32>
    %111 = vector.shape_cast %110 : vector<1x1x16x16xf32> to vector<16x16xf32>
    %112 = vector.shape_cast %109 : vector<16x16xf32> to vector<1x1x16x16xf32>
    tpu.vector_store %arg5[%c0_72, %c4_73, %c0_74, %c0_75], %112 {strides = array<i32>} : memref<1x8x16x16xf32, #tpu.memory_space<vmem>>, vector<1x1x16x16xf32>,
    %c5 = arith.constant 5 : index
    %c0_76 = arith.constant 0 : index
    %113 = memref.load %arg2[%c5, %c0_76] : memref<11x4xf32, #tpu.memory_space<smem>>
    %114 = vector.broadcast %113 : f32 to vector<16x16xf32>
    %115 = arith.mulf %1, %114 : vector<16x16xf32>
    %c5_77 = arith.constant 5 : index
    %116 = memref.load %arg3[%c5_77] : memref<11xf32, #tpu.memory_space<smem>>
    %117 = vector.broadcast %116 : f32 to vector<16x16xf32>
    %118 = arith.addf %115, %117 : vector<16x16xf32>
    %c5_78 = arith.constant 5 : index
    %c1_79 = arith.constant 1 : index
    %119 = memref.load %arg2[%c5_78, %c1_79] : memref<11x4xf32, #tpu.memory_space<smem>>
    %120 = vector.broadcast %119 : f32 to vector<16x16xf32>
    %121 = arith.mulf %3, %120 : vector<16x16xf32>
    %122 = arith.addf %118, %121 : vector<16x16xf32>
    %c5_80 = arith.constant 5 : index
    %c2_81 = arith.constant 2 : index
    %123 = memref.load %arg2[%c5_80, %c2_81] : memref<11x4xf32, #tpu.memory_space<smem>>
    %124 = vector.broadcast %123 : f32 to vector<16x16xf32>
    %125 = arith.mulf %5, %124 : vector<16x16xf32>
    %126 = arith.addf %122, %125 : vector<16x16xf32>
    %c5_82 = arith.constant 5 : index
    %c3_83 = arith.constant 3 : index
    %127 = memref.load %arg2[%c5_82, %c3_83] : memref<11x4xf32, #tpu.memory_space<smem>>
    %128 = vector.broadcast %127 : f32 to vector<16x16xf32>
    %129 = arith.mulf %7, %128 : vector<16x16xf32>
    %130 = arith.addf %126, %129 : vector<16x16xf32>
    %c0_84 = arith.constant 0 : index
    %c5_85 = arith.constant 5 : index
    %c0_86 = arith.constant 0 : index
    %c0_87 = arith.constant 0 : index
    %131 = vector.load %arg5[%c0_84, %c5_85, %c0_86, %c0_87] : memref<1x8x16x16xf32, #tpu.memory_space<vmem>>, vector<1x1x16x16xf32>
    %132 = vector.shape_cast %131 : vector<1x1x16x16xf32> to vector<16x16xf32>
    %133 = vector.shape_cast %130 : vector<16x16xf32> to vector<1x1x16x16xf32>
    tpu.vector_store %arg5[%c0_84, %c5_85, %c0_86, %c0_87], %133 {strides = array<i32>} : memref<1x8x16x16xf32, #tpu.memory_space<vmem>>, vector<1x1x16x16xf32>,
    %c6 = arith.constant 6 : index
    %c0_88 = arith.constant 0 : index
    %134 = memref.load %arg2[%c6, %c0_88] : memref<11x4xf32, #tpu.memory_space<smem>>
    %135 = vector.broadcast %134 : f32 to vector<16x16xf32>
    %136 = arith.mulf %1, %135 : vector<16x16xf32>
    %c6_89 = arith.constant 6 : index
    %137 = memref.load %arg3[%c6_89] : memref<11xf32, #tpu.memory_space<smem>>
    %138 = vector.broadcast %137 : f32 to vector<16x16xf32>
    %139 = arith.addf %136, %138 : vector<16x16xf32>
    %c6_90 = arith.constant 6 : index
    %c1_91 = arith.constant 1 : index
    %140 = memref.load %arg2[%c6_90, %c1_91] : memref<11x4xf32, #tpu.memory_space<smem>>
    %141 = vector.broadcast %140 : f32 to vector<16x16xf32>
    %142 = arith.mulf %3, %141 : vector<16x16xf32>
    %143 = arith.addf %139, %142 : vector<16x16xf32>
    %c6_92 = arith.constant 6 : index
    %c2_93 = arith.constant 2 : index
    %144 = memref.load %arg2[%c6_92, %c2_93] : memref<11x4xf32, #tpu.memory_space<smem>>
    %145 = vector.broadcast %144 : f32 to vector<16x16xf32>
    %146 = arith.mulf %5, %145 : vector<16x16xf32>
    %147 = arith.addf %143, %146 : vector<16x16xf32>
    %c6_94 = arith.constant 6 : index
    %c3_95 = arith.constant 3 : index
    %148 = memref.load %arg2[%c6_94, %c3_95] : memref<11x4xf32, #tpu.memory_space<smem>>
    %149 = vector.broadcast %148 : f32 to vector<16x16xf32>
    %150 = arith.mulf %7, %149 : vector<16x16xf32>
    %151 = arith.addf %147, %150 : vector<16x16xf32>
    %c0_96 = arith.constant 0 : index
    %c6_97 = arith.constant 6 : index
    %c0_98 = arith.constant 0 : index
    %c0_99 = arith.constant 0 : index
    %152 = vector.load %arg5[%c0_96, %c6_97, %c0_98, %c0_99] : memref<1x8x16x16xf32, #tpu.memory_space<vmem>>, vector<1x1x16x16xf32>
    %153 = vector.shape_cast %152 : vector<1x1x16x16xf32> to vector<16x16xf32>
    %154 = vector.shape_cast %151 : vector<16x16xf32> to vector<1x1x16x16xf32>
    tpu.vector_store %arg5[%c0_96, %c6_97, %c0_98, %c0_99], %154 {strides = array<i32>} : memref<1x8x16x16xf32, #tpu.memory_space<vmem>>, vector<1x1x16x16xf32>,
    %c7 = arith.constant 7 : index
    %c0_100 = arith.constant 0 : index
    %155 = memref.load %arg2[%c7, %c0_100] : memref<11x4xf32, #tpu.memory_space<smem>>
    %156 = vector.broadcast %155 : f32 to vector<16x16xf32>
    %157 = arith.mulf %1, %156 : vector<16x16xf32>
    %c7_101 = arith.constant 7 : index
    %158 = memref.load %arg3[%c7_101] : memref<11xf32, #tpu.memory_space<smem>>
    %159 = vector.broadcast %158 : f32 to vector<16x16xf32>
    %160 = arith.addf %157, %159 : vector<16x16xf32>
    %c7_102 = arith.constant 7 : index
    %c1_103 = arith.constant 1 : index
    %161 = memref.load %arg2[%c7_102, %c1_103] : memref<11x4xf32, #tpu.memory_space<smem>>
    %162 = vector.broadcast %161 : f32 to vector<16x16xf32>
    %163 = arith.mulf %3, %162 : vector<16x16xf32>
    %164 = arith.addf %160, %163 : vector<16x16xf32>
    %c7_104 = arith.constant 7 : index
    %c2_105 = arith.constant 2 : index
    %165 = memref.load %arg2[%c7_104, %c2_105] : memref<11x4xf32, #tpu.memory_space<smem>>
    %166 = vector.broadcast %165 : f32 to vector<16x16xf32>
    %167 = arith.mulf %5, %166 : vector<16x16xf32>
    %168 = arith.addf %164, %167 : vector<16x16xf32>
    %c7_106 = arith.constant 7 : index
    %c3_107 = arith.constant 3 : index
    %169 = memref.load %arg2[%c7_106, %c3_107] : memref<11x4xf32, #tpu.memory_space<smem>>
    %170 = vector.broadcast %169 : f32 to vector<16x16xf32>
    %171 = arith.mulf %7, %170 : vector<16x16xf32>
    %172 = arith.addf %168, %171 : vector<16x16xf32>
    %c0_108 = arith.constant 0 : index
    %c7_109 = arith.constant 7 : index
    %c0_110 = arith.constant 0 : index
    %c0_111 = arith.constant 0 : index
    %173 = vector.load %arg5[%c0_108, %c7_109, %c0_110, %c0_111] : memref<1x8x16x16xf32, #tpu.memory_space<vmem>>, vector<1x1x16x16xf32>
    %174 = vector.shape_cast %173 : vector<1x1x16x16xf32> to vector<16x16xf32>
    %175 = vector.shape_cast %172 : vector<16x16xf32> to vector<1x1x16x16xf32>
    tpu.vector_store %arg5[%c0_108, %c7_109, %c0_110, %c0_111], %175 {strides = array<i32>} : memref<1x8x16x16xf32, #tpu.memory_space<vmem>>, vector<1x1x16x16xf32>,
    %c8 = arith.constant 8 : index
    %c0_112 = arith.constant 0 : index
    %176 = memref.load %arg2[%c8, %c0_112] : memref<11x4xf32, #tpu.memory_space<smem>>
    %177 = vector.broadcast %176 : f32 to vector<16x16xf32>
    %178 = arith.mulf %1, %177 : vector<16x16xf32>
    %c8_113 = arith.constant 8 : index
    %179 = memref.load %arg3[%c8_113] : memref<11xf32, #tpu.memory_space<smem>>
    %180 = vector.broadcast %179 : f32 to vector<16x16xf32>
    %181 = arith.addf %178, %180 : vector<16x16xf32>
    %c8_114 = arith.constant 8 : index
    %c1_115 = arith.constant 1 : index
    %182 = memref.load %arg2[%c8_114, %c1_115] : memref<11x4xf32, #tpu.memory_space<smem>>
    %183 = vector.broadcast %182 : f32 to vector<16x16xf32>
    %184 = arith.mulf %3, %183 : vector<16x16xf32>
    %185 = arith.addf %181, %184 : vector<16x16xf32>
    %c8_116 = arith.constant 8 : index
    %c2_117 = arith.constant 2 : index
    %186 = memref.load %arg2[%c8_116, %c2_117] : memref<11x4xf32, #tpu.memory_space<smem>>
    %187 = vector.broadcast %186 : f32 to vector<16x16xf32>
    %188 = arith.mulf %5, %187 : vector<16x16xf32>
    %189 = arith.addf %185, %188 : vector<16x16xf32>
    %c8_118 = arith.constant 8 : index
    %c3_119 = arith.constant 3 : index
    %190 = memref.load %arg2[%c8_118, %c3_119] : memref<11x4xf32, #tpu.memory_space<smem>>
    %191 = vector.broadcast %190 : f32 to vector<16x16xf32>
    %192 = arith.mulf %7, %191 : vector<16x16xf32>
    %193 = arith.addf %189, %192 : vector<16x16xf32>
    %194 = arith.negf %193 : vector<16x16xf32>
    %195 = math.exp %194 : vector<16x16xf32>
    %cst = arith.constant 1.000000e+00 : f32
    %196 = vector.broadcast %cst : f32 to vector<16x16xf32>
    %197 = arith.addf %196, %195 : vector<16x16xf32>
    %198 = arith.divf %196, %197 : vector<16x16xf32>
    %c0_120 = arith.constant 0 : index
    %c0_121 = arith.constant 0 : index
    %c0_122 = arith.constant 0 : index
    %c0_123 = arith.constant 0 : index
    %199 = vector.load %arg6[%c0_120, %c0_121, %c0_122, %c0_123] : memref<1x1x16x16xf32, #tpu.memory_space<vmem>>, vector<1x1x16x16xf32>
    %200 = vector.shape_cast %199 : vector<1x1x16x16xf32> to vector<16x16xf32>
    %201 = vector.shape_cast %198 : vector<16x16xf32> to vector<1x1x16x16xf32>
    tpu.vector_store %arg6[%c0_120, %c0_121, %c0_122, %c0_123], %201 {strides = array<i32>} : memref<1x1x16x16xf32, #tpu.memory_space<vmem>>, vector<1x1x16x16xf32>,
    %c9 = arith.constant 9 : index
    %c0_124 = arith.constant 0 : index
    %202 = memref.load %arg2[%c9, %c0_124] : memref<11x4xf32, #tpu.memory_space<smem>>
    %203 = vector.broadcast %202 : f32 to vector<16x16xf32>
    %204 = arith.mulf %1, %203 : vector<16x16xf32>
    %c9_125 = arith.constant 9 : index
    %205 = memref.load %arg3[%c9_125] : memref<11xf32, #tpu.memory_space<smem>>
    %206 = vector.broadcast %205 : f32 to vector<16x16xf32>
    %207 = arith.addf %204, %206 : vector<16x16xf32>
    %c9_126 = arith.constant 9 : index
    %c1_127 = arith.constant 1 : index
    %208 = memref.load %arg2[%c9_126, %c1_127] : memref<11x4xf32, #tpu.memory_space<smem>>
    %209 = vector.broadcast %208 : f32 to vector<16x16xf32>
    %210 = arith.mulf %3, %209 : vector<16x16xf32>
    %211 = arith.addf %207, %210 : vector<16x16xf32>
    %c9_128 = arith.constant 9 : index
    %c2_129 = arith.constant 2 : index
    %212 = memref.load %arg2[%c9_128, %c2_129] : memref<11x4xf32, #tpu.memory_space<smem>>
    %213 = vector.broadcast %212 : f32 to vector<16x16xf32>
    %214 = arith.mulf %5, %213 : vector<16x16xf32>
    %215 = arith.addf %211, %214 : vector<16x16xf32>
    %c9_130 = arith.constant 9 : index
    %c3_131 = arith.constant 3 : index
    %216 = memref.load %arg2[%c9_130, %c3_131] : memref<11x4xf32, #tpu.memory_space<smem>>
    %217 = vector.broadcast %216 : f32 to vector<16x16xf32>
    %218 = arith.mulf %7, %217 : vector<16x16xf32>
    %219 = arith.addf %215, %218 : vector<16x16xf32>
    %220 = arith.negf %219 : vector<16x16xf32>
    %221 = math.exp %220 : vector<16x16xf32>
    %cst_132 = arith.constant 1.000000e+00 : f32
    %222 = vector.broadcast %cst_132 : f32 to vector<16x16xf32>
    %223 = arith.addf %222, %221 : vector<16x16xf32>
    %224 = arith.divf %222, %223 : vector<16x16xf32>
    %cst_133 = arith.constant 5.000000e-01 : f32
    %225 = vector.broadcast %cst_133 : f32 to vector<16x16xf32>
    %226 = arith.subf %224, %225 : vector<16x16xf32>
    %c0_134 = arith.constant 0 : index
    %c0_135 = arith.constant 0 : index
    %c0_136 = arith.constant 0 : index
    %c0_137 = arith.constant 0 : index
    %227 = vector.load %arg7[%c0_134, %c0_135, %c0_136, %c0_137] : memref<1x2x16x16xf32, #tpu.memory_space<vmem>>, vector<1x1x16x16xf32>
    %228 = vector.shape_cast %227 : vector<1x1x16x16xf32> to vector<16x16xf32>
    %229 = vector.shape_cast %226 : vector<16x16xf32> to vector<1x1x16x16xf32>
    tpu.vector_store %arg7[%c0_134, %c0_135, %c0_136, %c0_137], %229 {strides = array<i32>} : memref<1x2x16x16xf32, #tpu.memory_space<vmem>>, vector<1x1x16x16xf32>,
    %c10 = arith.constant 10 : index
    %c0_138 = arith.constant 0 : index
    %230 = memref.load %arg2[%c10, %c0_138] : memref<11x4xf32, #tpu.memory_space<smem>>
    %231 = vector.broadcast %230 : f32 to vector<16x16xf32>
    %232 = arith.mulf %1, %231 : vector<16x16xf32>
    %c10_139 = arith.constant 10 : index
    %233 = memref.load %arg3[%c10_139] : memref<11xf32, #tpu.memory_space<smem>>
    %234 = vector.broadcast %233 : f32 to vector<16x16xf32>
    %235 = arith.addf %232, %234 : vector<16x16xf32>
    %c10_140 = arith.constant 10 : index
    %c1_141 = arith.constant 1 : index
    %236 = memref.load %arg2[%c10_140, %c1_141] : memref<11x4xf32, #tpu.memory_space<smem>>
    %237 = vector.broadcast %236 : f32 to vector<16x16xf32>
    %238 = arith.mulf %3, %237 : vector<16x16xf32>
    %239 = arith.addf %235, %238 : vector<16x16xf32>
    %c10_142 = arith.constant 10 : index
    %c2_143 = arith.constant 2 : index
    %240 = memref.load %arg2[%c10_142, %c2_143] : memref<11x4xf32, #tpu.memory_space<smem>>
    %241 = vector.broadcast %240 : f32 to vector<16x16xf32>
    %242 = arith.mulf %5, %241 : vector<16x16xf32>
    %243 = arith.addf %239, %242 : vector<16x16xf32>
    %c10_144 = arith.constant 10 : index
    %c3_145 = arith.constant 3 : index
    %244 = memref.load %arg2[%c10_144, %c3_145] : memref<11x4xf32, #tpu.memory_space<smem>>
    %245 = vector.broadcast %244 : f32 to vector<16x16xf32>
    %246 = arith.mulf %7, %245 : vector<16x16xf32>
    %247 = arith.addf %243, %246 : vector<16x16xf32>
    %248 = arith.negf %247 : vector<16x16xf32>
    %249 = math.exp %248 : vector<16x16xf32>
    %cst_146 = arith.constant 1.000000e+00 : f32
    %250 = vector.broadcast %cst_146 : f32 to vector<16x16xf32>
    %251 = arith.addf %250, %249 : vector<16x16xf32>
    %252 = arith.divf %250, %251 : vector<16x16xf32>
    %cst_147 = arith.constant 5.000000e-01 : f32
    %253 = vector.broadcast %cst_147 : f32 to vector<16x16xf32>
    %254 = arith.subf %252, %253 : vector<16x16xf32>
    %c0_148 = arith.constant 0 : index
    %c1_149 = arith.constant 1 : index
    %c0_150 = arith.constant 0 : index
    %c0_151 = arith.constant 0 : index
    %255 = vector.load %arg7[%c0_148, %c1_149, %c0_150, %c0_151] : memref<1x2x16x16xf32, #tpu.memory_space<vmem>>, vector<1x1x16x16xf32>
    %256 = vector.shape_cast %255 : vector<1x1x16x16xf32> to vector<16x16xf32>
    %257 = vector.shape_cast %254 : vector<16x16xf32> to vector<1x1x16x16xf32>
    tpu.vector_store %arg7[%c0_148, %c1_149, %c0_150, %c0_151], %257 {strides = array<i32>} : memref<1x2x16x16xf32, #tpu.memory_space<vmem>>, vector<1x1x16x16xf32>,
    return
  }
  func.func @transform_0(%arg0: i32, %arg1: i32) -> (i32, i32) {
    %c0_i32 = arith.constant 0 : i32
    %c0_i32_0 = arith.constant 0 : i32
    %c0_i32_1 = arith.constant 0 : i32
    return %c0_i32, %c0_i32_0 : i32, i32
  }
  func.func @transform_1(%arg0: i32, %arg1: i32) -> i32 {
    %c0_i32 = arith.constant 0 : i32
    %c0_i32_0 = arith.constant 0 : i32
    return %c0_i32 : i32
  }
  func.func @transform_2(%arg0: i32, %arg1: i32) -> (i32, i32, i32, i32) {
    %c0_i32 = arith.constant 0 : i32
    %c0_i32_0 = arith.constant 0 : i32
    %c0_i32_1 = arith.constant 0 : i32
    return %arg0, %c0_i32, %arg1, %c0_i32_0 : i32, i32, i32, i32
  }
  func.func @transform_3(%arg0: i32, %arg1: i32) -> (i32, i32, i32, i32) {
    %c0_i32 = arith.constant 0 : i32
    %c0_i32_0 = arith.constant 0 : i32
    %c0_i32_1 = arith.constant 0 : i32
    return %arg0, %c0_i32, %arg1, %c0_i32_0 : i32, i32, i32, i32
  }
  func.func @transform_4(%arg0: i32, %arg1: i32) -> (i32, i32, i32, i32) {
    %c0_i32 = arith.constant 0 : i32
    %c0_i32_0 = arith.constant 0 : i32
    %c0_i32_1 = arith.constant 0 : i32
    return %arg0, %c0_i32, %arg1, %c0_i32_0 : i32, i32, i32, i32
  }
  func.func @transform_5(%arg0: i32, %arg1: i32) -> (i32, i32, i32, i32) {
    %c0_i32 = arith.constant 0 : i32
    %c0_i32_0 = arith.constant 0 : i32
    %c0_i32_1 = arith.constant 0 : i32
    return %arg0, %c0_i32, %arg1, %c0_i32_0 : i32, i32, i32, i32
  }
}

</mosaic_0001>

<bundles_post_ra>
// kernel: tpu_custom_call.1
= control target key start
LH: loop header
LB: loop body
LE: loop exit
PB: predicated region body
PF: predicated region fallthrough
CT: control target
= control target key end

     0   :  { %s2089_s0 = inlined_call_operand.vmem [shape: f32[11,4], index: 0, kind: input, shape index: {}]   ;;  %s2090_s1 = inlined_call_operand.vmem [shape: f32[11], index: 1, kind: input, shape index: {}]   ;;  %s2091_s2 = inlined_call_operand.hbm [shape: f32[2,4,16,16], index: 2, kind: input, shape index: {}]   ;;  %s2092_s3 = inlined_call_operand.hbm [shape: f32[2,8,16,16], index: 3, kind: output, shape index: {0}]   ;;  %s2093_s4 = inlined_call_operand.hbm [shape: f32[2,1,16,16], index: 4, kind: output, shape index: {1}]   ;;  %s2094_s5 = inlined_call_operand.hbm [shape: f32[2,2,16,16], index: 5, kind: output, shape index: {2}]  }
   0x1   :  { %2102 = sst [smem:[#allocation23_spill]] %s2089_s0 }
   0x2   :  { %2103 = sst [smem:[#allocation24_spill]] %s2090_s1 }
   0x3   :  { %2104 = sst [smem:[#allocation25_spill]] %s2091_s2 }
   0x4   :  { %11 = vsyncpa [#allocation5], 0 }
   0x5   :  { %12 = vsyncpa [#allocation7], 0 }
   0x6   :  { %13 = vsyncpa [#allocation3], 0 }
   0x7   :  { %15 = vsyncpa [#allocation3 + $0x1], 0 }
   0x8   :  { %16 = vsyncpa [#allocation4], 0 }
   0x9   :  { %18 = vsyncpa [#allocation4 + $0x1], 0 }
   0xa   :  { %19 = vsyncpa [#allocation11], 0 }
   0xb   :  { %21 = vsyncpa [#allocation11 + $0x1], 0  ;;  %s1493_s18 = smov 0   ;;  %s1495_s19 = smov 0  }
   0xc   :  { %s1497_s20 = smov 0   ;;  %s1499_s21 = smov 0  }
   0xd   :  { %s1501_s22 = smov 0   ;;  %s1503_s23 = smov 0  }
   0xe LB: > { %2105 = sst [smem:[#allocation18_spill]] %s1439_s19  ;;  %s1524_s24 = sadd.s32 4294967295, %s1455_s23   ;;  %s1455_s23 = sphi %s1503_s23, %s27_s23   ;;  %s1451_s22 = sphi %s1501_s22, %s2140_s22   ;;  %s1447_s21 = sphi %s1499_s21, %s2139_s21   ;;  %s1443_s20 = sphi %s1497_s20, %s2138_s20   ;;  %s1439_s19 = sphi %s1495_s19, %s2137_s19   ;;  %s1435_s18 = sphi %s1493_s18, %s2136_s18  }
   0xf   : > { %2106 = sst [smem:[#allocation19_spill]] %s1443_s20  ;;  %s2095_s25 = sadd.s32 4294967294, %s1455_s23  }
  0x10   : > { %2107 = sst [smem:[#allocation20_spill]] %s1451_s22  ;;  %p103_p0 = scmp.ne.s32.totalorder %s1439_s19, %s1435_s18 }
  0x11   : > { %p104_p1 = scmp.eq.s32.totalorder %s1524_s24, 0  ;;  %p135_p2 = scmp.eq.s32.totalorder %s2095_s25, 1 }
  0x12   : > { %p1010_p4 = scmp.ge.s32.totalorder %s1455_s23, 1  ;;  %p198_p6 = scmp.lt.s32.totalorder %s1455_s23, 3 }
  0x13   : > { %p1534_p3 = por %p104_p1, %p103_p0  ;;  %p1539_p5 = por %p135_p2, %p103_p0 }
  0x14   : > { %s2110_s0 = sld [smem:[#allocation23_spill]]  ;;  %p1547_p7 = pnand %p1010_p4, %p198_p6 }
  0x15   : > { %p1013_p9 = scmp.ge.s32.totalorder %s1455_s23, 2  ;;  %s2112_s1 = sld [smem:[#allocation24_spill]] }
  0x16   : > { %p1140_p8 = pneg %p1547_p7  ;;  %s1457_s10 = smov [#allocation2]  }
  0x17   : > { %s2096_s11 = smov 128   ;;  %s2097_s12 = smov 8  }
  0x18   : > { %p1141_p10 = pnand %p1140_p8, %p104_p1  ;;  %s1460_s13 = smov [#allocation6]  }
  0x19   : > { %p129_p11 = scmp.eq.s32.totalorder %s1524_s24, 1  ;;  %s39_s14 = sadd.s32 1, %s1451_s22 }
  0x1a   : > { %s209_s30 = sshll.u32 %s2110_s0, 4  ;;  %p41_p12 = scmp.ge.s32.totalorder %s39_s14, 2  ;;  %s210_s30 = int_to_ptr.vmem [resolvable:$true] %s209_s30 }
  0x1b   : > { %s222_s9 = sshll.u32 %s2112_s1, 4  ;;  %s90_s15 = sadd.s32 1, %s1443_s20  ;;  %s223_s9 = int_to_ptr.vmem [resolvable:$true] %s222_s9 }
  0x1c   : > { %1143 = dma.vmem_to_smem (!%p1141_p10), %s210_s30, 256, %s1457_s10, [#allocation5], %s2096_s11, %s2096_s11, %s2097_s12  }
  0x1d   : > { %1146 = dma.vmem_to_smem (!%p1141_p10), %s223_s9, 16, %s1460_s13, [#allocation7]  }
  0x1e   : > { %p97_p13 = scmp.ne.s32.totalorder %s1443_s20, %s1439_s19  ;;  %p98_p0 = scmp.eq.s32.totalorder %s1455_s23, 0 }
  0x1f   : > { %s2142_s14 = smov (%p41_p12, %s39_s14), 0  ;;  %p1163_p4 = scmp.lt.s32.totalorder %s1455_s23, 2 }
  0x20   : > { %2113 = sst [smem:[#allocation21_spill]] %s2142_s14  ;;  %p1570_p2 = por %p129_p11, %p97_p13 }
  0x21   : > { %s85_s17 = ssub.s32 %s1451_s22, %s2142_s14  ;;  %s233_s28 = sand.u32 1, %s1443_s20  }
  0x22   : > { %p88_p6 = scmp.eq.s32.totalorder %s85_s17, 0  ;;  %p99_p8 = por %p98_p0, %p97_p13 }
  0x23   : > { %s1014_s29 = sshll.u32 %s233_s28, 6  ;;  %s1120_s30 = sshll.u32 %s1451_s22, 6 }
  0x24   : > { %s1580_s7 = scalar_select %p88_p6, %s1443_s20, %s90_s15  }
  0x25   : > { %s2116_s2 = sld [smem:[#allocation25_spill]]  ;;  %s237_s25 = scalar_lea.vmem [#allocation8], %s1014_s29 }
  0x26   : > { %2115 = sst [smem:[#allocation22_spill]] %s1580_s7  ;;  %s247_s11 = sshll.u32 %s237_s25, 4  ;;  %s248_s11 = int_to_ptr.vmem [resolvable:$true] %s247_s11 }
  0x27   : > { %p1148_p10 = pnand %p1163_p4, %p99_p8  ;;  %s234_s12 = scalar_lea.sflag [#allocation3], %s233_s28 }
  0x28   : > { %s2117_s0 = smov 8   ;;  %s2118_s1 = smov 128  }
  0x29   : > { %259 = sbr.rel (%p1547_p7) target bundleno = 179 (0xb3), region = 32 }
  0x2b   : > { %s244_s10 = scalar_lea.hbm %s2116_s2, %s1120_s30 }
  0x2c   : > { %s245_s13 = sshll.u32 %s244_s10, 4  ;;  %s246_s13 = int_to_ptr.hbm [resolvable:$true] %s245_s13 }
  0x2d   : > { %1150 = dma.hbm_to_vmem [thread:$0]  (!%p1148_p10), %s246_s13, 1024, %s248_s11, %s234_s12, %s2118_s1, %s2118_s1, %s2117_s0  }
  0x2e   : > { %1414 = dma.done.wait (%p104_p1), [#allocation5], 256  }
  0x2f   : > { %1416 = vsyncadd (%p104_p1), [#allocation5], 4294967040 }
  0x30   : > { %1418 = dma.done.wait (%p104_p1), [#allocation7], 16  }
  0x31   : > { %1420 = vsyncadd (%p104_p1), [#allocation7], 4294967280  ;;  %s1601_s25 = sand.u32 1, %s1439_s19  }
  0x32   : > { %s1020_s0 = sshll.u32 %s1601_s25, 6  ;;  %s272_s1 = scalar_lea.sflag [#allocation3], %s1601_s25 }
  0x33   : > { %s275_s6 = scalar_lea.vmem [#allocation8], %s1020_s0 }
  0x34   : > { %1422 = dma.done.wait (%p1534_p3), %s272_s1, 1024  }
  0x35   : > { %1424 = vsyncadd (%p1534_p3), %s272_s1, 4294966272 }
  0x36   : > { %281 = sfence }
  0x37   : > { %s1082_s11 = sld [smem:[#allocation2 + $0x400]]  ;;  %v1609_v0 = vld [vmem:[%s275_s6] sm:$0xff]  ;;  %v1611_v1 = vld [vmem:[%s275_s6 + $0x8] sm:$0xff]  ;;  %v1615_v2 = vld [vmem:[%s275_s6 + $0x10] sm:$0xff]  ;;  %vm355_vm0 = vcmask 130048  }
  0x38   : > { %s1083_s12 = sld [smem:[#allocation6 + $0x8]]  ;;  %v1619_v4 = vld [vmem:[%s275_s6 + $0x20] sm:$0xff]  ;;  %v1622_v7 = vld [vmem:[%s275_s6 + $0x18] sm:$0xff]  ;;  %v1624_v8 = vld [vmem:[%s275_s6 + $0x28] sm:$0xff] }
  0x39   : > { %s1084_s15 = sld [smem:[#allocation2 + $0x401]]  ;;  %v1629_v10 = vld [vmem:[%s275_s6 + $0x30] sm:$0xff]  ;;  %v1631_v12 = vld [vmem:[%s275_s6 + $0x38] sm:$0xff] }
  0x3a   : > { %s1085_s17 = sld [smem:[#allocation2 + $0x402]] }
  0x3b   : > { %s1086_s28 = sld [smem:[#allocation2 + $0x403]] }
  0x3c   : > { %s1613_s29 = sld [smem:[#allocation2]] }
  0x3d   : > { %v562_v3 = vstv %s1082_s11  ;;  %s1617_s30 = sld [smem:[#allocation6]] }
  0x3e   : > { %v563_v5 = vmul.f32 %v562_v3, %v1609_v0  ;;  %v566_v6 = vstv %s1083_s12  ;;  %v564_v9 = vmul.f32 %v562_v3, %v1611_v1  ;;  %s1627_s26 = sld [smem:[#allocation2 + $0x1]]  ;;  %s1021_s12 = sshll.u32 %s1601_s25, 7 }
  0x3f   : > { %v570_v11 = vstv %s1084_s15  ;;  %s1633_s8 = sld [smem:[#allocation2 + $0x2]] }
  0x40   : > { %v567_v13 = vadd.f32 %v566_v6, %v563_v5  ;;  %v571_v14 = vmul.f32 %v1615_v2, %v570_v11  ;;  %v576_v15 = vstv %s1085_s17  ;;  %v568_v16 = vadd.f32 %v566_v6, %v564_v9  ;;  %s1636_s9 = sld [smem:[#allocation2 + $0x3]] }
  0x41   : > { %v577_v17 = vmul.f32 %v1619_v4, %v576_v15  ;;  %v582_v18 = vstv %s1086_s28  ;;  %v572_v19 = vmul.f32 %v1622_v7, %v570_v11  ;;  %v578_v20 = vmul.f32 %v1624_v8, %v576_v15  ;;  %s1641_s10 = sld [smem:[#allocation2 + $0x80]] }
  0x42   : > { %v573_v21 = vadd.f32 %v571_v14, %v567_v13  ;;  %v583_v22 = vmul.f32 %v1629_v10, %v582_v18  ;;  %v584_v23 = vmul.f32 %v1631_v12, %v582_v18  ;;  %v330_v24 = vstv %s1613_s29  ;;  %s1646_s13 = sld [smem:[#allocation6 + $0x1]] }
  0x43   : > { %v574_v25 = vadd.f32 %v572_v19, %v568_v16  ;;  %v331_v26 = vmul.f32 %v330_v24, %v1609_v0  ;;  %v334_v27 = vstv %s1617_s30  ;;  %v332_v28 = vmul.f32 %v330_v24, %v1611_v1  ;;  %s1651_s0 = sld [smem:[#allocation2 + $0x81]]  ;;  %s1686_s30 = scalar_lea.vmem [#allocation9], %s1021_s12 }
  0x44   : > { %v579_v29 = vadd.f32 %v577_v17, %v573_v21  ;;  %v338_v30 = vstv %s1627_s26  ;;  %s1654_s1 = sld [smem:[#allocation2 + $0x82]] }
  0x45   : > { %v580_v31 = vadd.f32 %v578_v20, %v574_v25  ;;  %v335_v32 = vadd.f32 %v334_v27, %v331_v26  ;;  %v339_v33 = vmul.f32 %v1615_v2, %v338_v30  ;;  %v344_v34 = vstv %s1633_s8  ;;  %s1658_s6 = sld [smem:[#allocation2 + $0x83]] }
  0x46   : > { %v585_v35 = vadd.f32 %v583_v22, %v579_v29  ;;  %v345_v36 = vmul.f32 %v1619_v4, %v344_v34  ;;  %v350_v37 = vstv %s1636_s9  ;;  %v336_v38 = vadd.f32 %v334_v27, %v332_v28  ;;  %s1662_s11 = sld [smem:[#allocation2 + $0x100]] }
  0x47   : > { %v586_v39 = vadd.f32 %v584_v23, %v580_v31  ;;  %v341_v40 = vadd.f32 %v339_v33, %v335_v32  ;;  %v351_v41 = vmul.f32 %v1629_v10, %v350_v37  ;;  %v340_v42 = vmul.f32 %v1622_v7, %v338_v30  ;;  %s1667_s15 = sld [smem:[#allocation6 + $0x2]] }
  0x48   : > { %v1087_v43 = vmul.f32 -1.442695, %v585_v35  ;;  %v346_v44 = vmul.f32 %v1624_v8, %v344_v34  ;;  %v352_v45 = vmul.f32 %v1631_v12, %v350_v37  ;;  %v359_v46 = vstv %s1641_s10  ;;  %s1672_s17 = sld [smem:[#allocation2 + $0x101]] }
  0x49   : > { %v1088_v47 = vmul.f32 -1.442695, %v586_v39  ;;  %v347_v48 = vadd.f32 %v345_v36, %v341_v40  ;;  %v342_v49 = vadd.f32 %v340_v42, %v336_v38  ;;  %v360_v50 = vmul.f32 %v359_v46, %v1609_v0  ;;  %s1675_s28 = sld [smem:[#allocation2 + $0x102]] }
  0x4a   : > { %1221 = vpow2.f32 %v1087_v43  ;;  %v363_v51 = vstv %s1646_s13  ;;  %v367_v52 = vstv %s1651_s0  ;;  %v373_v53 = vstv %s1654_s1  ;;  %s1680_s29 = sld [smem:[#allocation2 + $0x103]] }
  0x4b   : > { %1223 = vpow2.f32 %v1088_v47  ;;  %v353_v54 = vadd.f32 %v351_v41, %v347_v48  ;;  %v348_v55 = vadd.f32 %v346_v44, %v342_v49  ;;  %v364_v56 = vadd.f32 %v363_v51, %v360_v50  ;;  %s1692_s26 = sld [smem:[#allocation2 + $0x180]] }
  0x4c   : > { %v368_v57 = vmul.f32 %v1615_v2, %v367_v52  ;;  %v374_v58 = vmul.f32 %v1619_v4, %v373_v53  ;;  %v379_v59 = vstv %s1658_s6  ;;  %v361_v60 = vmul.f32 %v359_v46, %v1611_v1  ;;  %s1696_s8 = sld [smem:[#allocation6 + $0x3]] }
  0x4d   : > { %356 = vst.msk [vmem:[%s1686_s30] sm:$0xff] %vm355_vm0, %v353_v54  ;;  %v354_v61 = vadd.f32 %v352_v45, %v348_v55  ;;  %v380_v62 = vmul.f32 %v1629_v10, %v379_v59  ;;  %v369_v63 = vmul.f32 %v1622_v7, %v367_v52  ;;  %v375_v6 = vmul.f32 %v1624_v8, %v373_v53  ;;  %s1703_s9 = sld [smem:[#allocation2 + $0x181]] }
  0x4e   : > { %v370_v3 = vadd.f32 %v368_v57, %v364_v56  ;;  %v365_v5 = vadd.f32 %v363_v51, %v361_v60  ;;  %v388_v9 = vstv %s1662_s11  ;;  %v392_v13 = vstv %s1667_s15  ;;  %s1707_s10 = sld [smem:[#allocation2 + $0x182]] }
  0x4f   : > { %357 = vst.msk [vmem:[%s1686_s30 + $0x8] sm:$0xff] %vm355_vm0, %v354_v61  ;;  %v389_v11 = vmul.f32 %v388_v9, %v1609_v0  ;;  %v396_v14 = vstv %s1672_s17  ;;  %v381_v18 = vmul.f32 %v1631_v12, %v379_v59  ;;  %v402_v19 = vstv %s1675_s28  ;;  %s1713_s13 = sld [smem:[#allocation2 + $0x183]]  ;;  %s1022_s28 = sshll.u32 %s1601_s25, 4 }
  0x50   : > { %v1222_v15 = vpop.eup %1221  ;;  %v376_v16 = vadd.f32 %v374_v58, %v370_v3  ;;  %v371_v17 = vadd.f32 %v369_v63, %v365_v5  ;;  %v397_v23 = vmul.f32 %v1615_v2, %v396_v14  ;;  %v408_v24 = vstv %s1680_s29  ;;  %s1730_s0 = sld [smem:[#allocation2 + $0x200]] }
  0x51   : > { %v1224_v20 = vpop.eup %1223  ;;  %v1709_v21 = vadd.f32 1.0, %v1222_v15  ;;  %v393_v22 = vadd.f32 %v392_v13, %v389_v11  ;;  %v390_v28 = vmul.f32 %v388_v9, %v1611_v1  ;;  %v403_v30 = vmul.f32 %v1619_v4, %v402_v19  ;;  %s1737_s1 = sld [smem:[#allocation6 + $0x4]] }
  0x52   : > { %v1715_v25 = vadd.f32 1.0, %v1224_v20  ;;  %v382_v26 = vadd.f32 %v380_v62, %v376_v16  ;;  %v377_v27 = vadd.f32 %v375_v6, %v371_v17  ;;  %v409_v31 = vmul.f32 %v1629_v10, %v408_v24  ;;  %s1744_s6 = sld [smem:[#allocation2 + $0x201]] }
  0x53   : > { %1225 = vrcp.f32 %v1709_v21  ;;  %v606_v29 = vand.u32 2147483648, %v1709_v21  ;;  %vm600_vm1 = vweird.f32 %v1709_v21  ;;  %v604_v32 = vand.u32 2147483647, %v1709_v21  ;;  %s1753_s11 = sld [smem:[#allocation2 + $0x202]] }
  0x54   : > { %1227 = vrcp.f32 %v1715_v25  ;;  %v621_v33 = vand.u32 2147483648, %v1715_v25  ;;  %1038 = vst.msk [vmem:[%s1686_s30 + $0x10] sm:$0xff] %vm355_vm0, %v382_v26  ;;  %vm615_vm2 = vweird.f32 %v1715_v25  ;;  %v619_v34 = vand.u32 2147483647, %v1715_v25  ;;  %s1762_s12 = sld [smem:[#allocation2 + $0x203]] }
  0x55   : > { %v383_v35 = vadd.f32 %v381_v18, %v377_v27  ;;  %v399_v36 = vadd.f32 %v397_v23, %v393_v22  ;;  %v1732_v37 = vor.u32 1.1754944e-38, %v606_v29  ;;  %v394_v39 = vadd.f32 %v392_v13, %v390_v28  ;;  %s1770_s15 = sld [smem:[#allocation2 + $0x280]] }
  0x56   : > { %v1734_v38 = vor.u32 1.1754944e-38, %v621_v33  ;;  %v398_v40 = vmul.f32 %v1622_v7, %v396_v14  ;;  %v404_v42 = vmul.f32 %v1624_v8, %v402_v19  ;;  %v410_v43 = vmul.f32 %v1631_v12, %v408_v24  ;;  %s1773_s17 = sld [smem:[#allocation6 + $0x5]] }
  0x57   : > { %1039 = vst.msk [vmem:[%s1686_s30 + $0x18] sm:$0xff] %vm355_vm0, %v383_v35  ;;  %v405_v41 = vadd.f32 %v403_v30, %v399_v36  ;;  %v417_v44 = vstv %s1692_s26  ;;  %vm1746_vm3 = vcmp.eq.f32.partialorder %v604_v32, 8.507059e+37  ;;  %v421_v48 = vstv %s1696_s8  ;;  %s1779_s29 = sld [smem:[#allocation2 + $0x281]] }
  0x58   : > { %v400_v46 = vadd.f32 %v398_v40, %v394_v39  ;;  %v418_v47 = vmul.f32 %v417_v44, %v1609_v0  ;;  %v425_v49 = vstv %s1703_s9  ;;  %vm1755_vm4 = vcmp.eq.f32.partialorder %v619_v34, 8.507059e+37  ;;  %s1784_s26 = sld [smem:[#allocation2 + $0x282]] }
  0x59   : > { %v1226_v50 = vpop.eup %1225  ;;  %v411_v52 = vadd.f32 %v409_v31, %v405_v41  ;;  %v426_v53 = vmul.f32 %v1615_v2, %v425_v49  ;;  %v431_v54 = vstv %s1707_s10  ;;  %v437_v55 = vstv %s1713_s13  ;;  %s1796_s8 = sld [smem:[#allocation2 + $0x283]] }
  0x5a   : > { %v1228_v56 = vpop.eup %1227  ;;  %v596_v57 = vmul.f32 %v1226_v50, %v1709_v21  ;;  %vm601_vm5 = vweird.f32 %v1226_v50  ;;  %v406_v58 = vadd.f32 %v404_v42, %v400_v46  ;;  %v422_v59 = vadd.f32 %v421_v48, %v418_v47  ;;  %s1806_s9 = sld [smem:[#allocation2 + $0x300]] }
  0x5b   : > { %v611_v60 = vmul.f32 %v1228_v56, %v1715_v25  ;;  %vm616_vm6 = vweird.f32 %v1228_v56  ;;  %1045 = vst.msk [vmem:[%s1686_s30 + $0x20] sm:$0xff] %vm355_vm0, %v411_v52  ;;  %v432_v61 = vmul.f32 %v1619_v4, %v431_v54  ;;  %v438_v62 = vmul.f32 %v1629_v10, %v437_v55  ;;  %vm1789_vm7 = vmor %vm600_vm1, %vm601_vm5  ;;  %s1810_s10 = sld [smem:[#allocation6 + $0x6]] }
  0x5c   : > { %v597_v63 = vsub.f32 1.0, %v596_v57  ;;  %v412_v3 = vadd.f32 %v410_v43, %v406_v58  ;;  %v428_v5 = vadd.f32 %v426_v53, %v422_v59  ;;  %v419_v6 = vmul.f32 %v417_v44, %v1611_v1  ;;  %vm1801_vm8 = vmor %vm615_vm2, %vm616_vm6  ;;  %s1818_s13 = sld [smem:[#allocation2 + $0x301]] }
  0x5d   : > { %v612_v9 = vsub.f32 1.0, %v611_v60  ;;  %v427_v11 = vmul.f32 %v1622_v7, %v425_v49  ;;  %v433_v13 = vmul.f32 %v1624_v8, %v431_v54  ;;  %v439_v14 = vmul.f32 %v1631_v12, %v437_v55  ;;  %s1843_s2 = sld [smem:[#allocation2 + $0x380]] }
  0x5e   : > { %v598_v15 = vmul.f32 %v1226_v50, %v597_v63  ;;  %1046 = vst.msk [vmem:[%s1686_s30 + $0x28] sm:$0xff] %vm355_vm0, %v412_v3  ;;  %v434_v16 = vadd.f32 %v432_v61, %v428_v5  ;;  %v423_v17 = vadd.f32 %v421_v48, %v419_v6  ;;  %v446_v18 = vstv %s1730_s0  ;;  %s1122_s0 = sshll.u32 %s1447_s21, 4  ;;  %s1862_s22 = sld [smem:[#allocation2 + $0x381]] }
  0x5f   : > { %v613_v20 = vmul.f32 %v1228_v56, %v612_v9  ;;  %v447_v22 = vmul.f32 %v446_v18, %v1609_v0  ;;  %v450_v23 = vstv %s1737_s1  ;;  %v454_v24 = vstv %s1744_s6  ;;  %s306_s1 = scalar_lea.vmem [#allocation10], %s1022_s28  ;;  %s769_s28 = sand.u32 1, %s1524_s24  }
  0x60   : > { %v599_v26 = vadd.f32 %v1226_v50, %v598_v15  ;;  %v440_v21 = vadd.f32 %v438_v62, %v434_v16  ;;  %v429_v28 = vadd.f32 %v427_v11, %v423_v17  ;;  %v455_v29 = vmul.f32 %v1615_v2, %v454_v24  ;;  %s808_s6 = sshll.u32 %s306_s1, 4  ;;  %s1848_s7 = scalar_lea.hbm %s2093_s4, %s1122_s0  ;;  %s1850_s6 = int_to_ptr.vmem [resolvable:$true] %s808_s6 }
  0x61   : > { %v614_v30 = vadd.f32 %v1228_v56, %v613_v20  ;;  %v451_v31 = vadd.f32 %v450_v23, %v447_v22  ;;  %v460_v32 = vstv %s1753_s11  ;;  %v466_v33 = vstv %s1762_s12  ;;  %s1829_s11 = sld [smem:[#allocation2 + $0x302]] }
  0x62   : > { %v603_v25 = vsel %vm1789_vm7, %v1226_v50, %v599_v26  ;;  %1052 = vst.msk [vmem:[%s1686_s30 + $0x30] sm:$0xff] %vm355_vm0, %v440_v21  ;;  %v435_v34 = vadd.f32 %v433_v13, %v429_v28  ;;  %v461_v35 = vmul.f32 %v1619_v4, %v460_v32  ;;  %v467_v36 = vmul.f32 %v1629_v10, %v466_v33  ;;  %s1837_s12 = sld [smem:[#allocation2 + $0x303]] }
  0x63   : > { %v608_v39 = vsel %vm1746_vm3, %v1732_v37, %v603_v25  ;;  %v618_v40 = vsel %vm1801_vm8, %v1228_v56, %v614_v30  ;;  %v457_v41 = vadd.f32 %v455_v29, %v451_v31  ;;  %v448_v42 = vmul.f32 %v446_v18, %v1611_v1  ;;  %s1867_s14 = sld [smem:[#allocation2 + $0x382]] }
  0x64   : > { %625 = vst.msk [vmem:[%s306_s1] sm:$0xff] %vm355_vm0, %v608_v39  ;;  %v623_v43 = vsel %vm1755_vm4, %v1734_v38, %v618_v40  ;;  %v441_v37 = vadd.f32 %v439_v14, %v435_v34  ;;  %v456_v44 = vmul.f32 %v1622_v7, %v454_v24  ;;  %v462_v45 = vmul.f32 %v1624_v8, %v460_v32 }
  0x65   : > { %626 = vst.msk [vmem:[%s306_s1 + $0x8] sm:$0xff] %vm355_vm0, %v623_v43  ;;  %v463_v46 = vadd.f32 %v461_v35, %v457_v41  ;;  %v452_v47 = vadd.f32 %v450_v23, %v448_v42  ;;  %v468_v48 = vmul.f32 %v1631_v12, %v466_v33  ;;  %v475_v49 = vstv %s1770_s15  ;;  %s1858_s15 = sld [smem:[#allocation6 + $0x7]] }
  0x66   : > { %1053 = vst.msk [vmem:[%s1686_s30 + $0x38] sm:$0xff] %vm355_vm0, %v441_v37  ;;  %v476_v38 = vmul.f32 %v475_v49, %v1609_v0  ;;  %v479_v50 = vstv %s1773_s17  ;;  %v483_v51 = vstv %s1779_s29  ;;  %v489_v52 = vstv %s1784_s26  ;;  %s810_s17 = sshll.u32 %s1848_s7, 4  ;;  %s1875_s29 = sld [smem:[#allocation2 + $0x383]]  ;;  %s1886_s17 = int_to_ptr.hbm [resolvable:$true] %s810_s17 }
  0x67   : > { %v469_v53 = vadd.f32 %v467_v36, %v463_v46  ;;  %v458_v54 = vadd.f32 %v456_v44, %v452_v47  ;;  %v484_v55 = vmul.f32 %v1615_v2, %v483_v51  ;;  %v490_v56 = vmul.f32 %v1619_v4, %v489_v52  ;;  %s1879_s26 = sld [smem:[#allocation2 + $0x480]] }
  0x68   : > { %v480_v57 = vadd.f32 %v479_v50, %v476_v38  ;;  %v495_v58 = vstv %s1796_s8  ;;  %v477_v59 = vmul.f32 %v475_v49, %v1611_v1  ;;  %v485_v60 = vmul.f32 %v1622_v7, %v483_v51  ;;  %s1884_s7 = sld [smem:[#allocation6 + $0x9]] }
  0x69   : > { %1059 = vst.msk [vmem:[%s1686_s30 + $0x40] sm:$0xff] %vm355_vm0, %v469_v53  ;;  %v464_v61 = vadd.f32 %v462_v45, %v458_v54  ;;  %v496_v62 = vmul.f32 %v1629_v10, %v495_v58  ;;  %v491_v63 = vmul.f32 %v1624_v8, %v489_v52  ;;  %v497_v3 = vmul.f32 %v1631_v12, %v495_v58  ;;  %s1890_s8 = sld [smem:[#allocation2 + $0x481]] }
  0x6a   : > { %v486_v5 = vadd.f32 %v484_v55, %v480_v57  ;;  %v481_v6 = vadd.f32 %v479_v50, %v477_v59  ;;  %v504_v9 = vstv %s1806_s9  ;;  %v508_v11 = vstv %s1810_s10  ;;  %s1897_s9 = sld [smem:[#allocation2 + $0x482]]  ;;  %s1903_s10 = scalar_lea.sflag [#allocation11], %s769_s28 }
  0x6b   : > { %v470_v13 = vadd.f32 %v468_v48, %v464_v61  ;;  %v505_v14 = vmul.f32 %v504_v9, %v1609_v0  ;;  %v512_v15 = vstv %s1818_s13  ;;  %v518_v16 = vstv %s1829_s11  ;;  %s1319_s13 = sshra.s32 %s1886_s17, 4  ;;  %s1320_s13 = int_to_ptr.hbm [resolvable:$true] %s1319_s13 }
  0x6c   : > { %v492_v17 = vadd.f32 %v490_v56, %v486_v5  ;;  %v487_v18 = vadd.f32 %v485_v60, %v481_v6  ;;  %v513_v19 = vmul.f32 %v1615_v2, %v512_v15  ;;  %v519_v20 = vmul.f32 %v1619_v4, %v518_v16  ;;  %s1321_s0 = scalar_lea.hbm %s1320_s13, 16  ;;  %p1326_p11 = scmp.lt.s32.totalorder %s1320_s13, %s2093_s4 }
  0x6d   : > { %1060 = vst.msk [vmem:[%s1686_s30 + $0x48] sm:$0xff] %vm355_vm0, %v470_v13  ;;  %v509_v22 = vadd.f32 %v508_v11, %v505_v14  ;;  %v524_v23 = vstv %s1837_s12  ;;  %v506_v24 = vmul.f32 %v504_v9, %v1611_v1  ;;  %v514_v26 = vmul.f32 %v1622_v7, %v512_v15  ;;  %p1322_p1 = scmp.ne.s32.totalorder %s1320_s13, %s1321_s0  ;;  %s1325_s12 = scalar_lea.hbm %s2093_s4, 32 }
  0x6e   : > { %v498_v27 = vadd.f32 %v496_v62, %v492_v17  ;;  %v493_v21 = vadd.f32 %v491_v63, %v487_v18  ;;  %v525_v28 = vmul.f32 %v1629_v10, %v524_v23  ;;  %v520_v29 = vmul.f32 %v1624_v8, %v518_v16  ;;  %p1327_p12 = scmp.lt.s32.totalorder %s1325_s12, %s1321_s0 }
  0x6f   : > { %p1323_p3 = pnand %p1322_p1, %p1570_p2 }
  0x70   : > { %p1328_p13 = por %p1327_p12, %p1326_p11 }
  0x71   : > { %p1324_p7 = pneg %p1323_p3 }
  0x73   : > { %p1329_p0 = pnand %p1328_p13, %p1324_p7 }
  0x75   : > { %1332 = shalt.err (!%p1329_p0)
}
  0x76   : > { %s1461_s24 = smov 128   ;;  %s1462_s28 = smov 8   ;;  %v515_v30 = vadd.f32 %v513_v19, %v509_v22  ;;  %v510_v31 = vadd.f32 %v508_v11, %v506_v24  ;;  %v526_v32 = vmul.f32 %v1631_v12, %v524_v23  ;;  %v533_v33 = vstv %s1843_s2  ;;  %1066 = vst.msk [vmem:[%s1686_s30 + $0x50] sm:$0xff] %vm355_vm0, %v498_v27 }
  0x77   : > { %1135 = dma.vmem_to_hbm [thread:$0]  (%p1570_p2), %s1850_s6, 256, %s1886_s17, %s1903_s10, %s1461_s24, %s1461_s24, %s1462_s28   ;;  %v499_v25 = vadd.f32 %v497_v3, %v493_v21  ;;  %v534_v34 = vmul.f32 %v533_v33, %v1609_v0  ;;  %v535_v45 = vmul.f32 %v533_v33, %v1611_v1 }
  0x78   : > { %s1924_s19 = sld [smem:[#allocation2 + $0x483]]  ;;  %v537_v35 = vstv %s1858_s15  ;;  %v541_v36 = vstv %s1862_s22  ;;  %v521_v39 = vadd.f32 %v519_v20, %v515_v30  ;;  %v516_v40 = vadd.f32 %v514_v26, %v510_v31  ;;  %s1121_s2 = sshll.u32 %s1447_s21, 7 }
  0x79   : > { %s1931_s20 = sld [smem:[#allocation2 + $0x500]]  ;;  %v542_v41 = vmul.f32 %v1615_v2, %v541_v36  ;;  %v547_v42 = vstv %s1867_s14  ;;  %1067 = vst.msk [vmem:[%s1686_s30 + $0x58] sm:$0xff] %vm355_vm0, %v499_v25  ;;  %v538_v43 = vadd.f32 %v537_v35, %v534_v34  ;;  %v553_v44 = vstv %s1875_s29  ;;  %s1956_s13 = scalar_lea.hbm %s2092_s3, %s1121_s2 }
  0x7a   : > { %s1935_s6 = sld [smem:[#allocation6 + $0xa]]  ;;  %v548_v37 = vmul.f32 %v1619_v4, %v547_v42  ;;  %v527_v46 = vadd.f32 %v525_v28, %v521_v39  ;;  %v522_v47 = vadd.f32 %v520_v29, %v516_v40  ;;  %v554_v48 = vmul.f32 %v1629_v10, %v553_v44  ;;  %s1353_s11 = scalar_lea.hbm %s2092_s3, 256 }
  0x7b   : > { %s1943_s15 = sld [smem:[#allocation2 + $0x501]]  ;;  %v543_v49 = vmul.f32 %v1622_v7, %v541_v36  ;;  %v544_v38 = vadd.f32 %v542_v41, %v538_v43  ;;  %v539_v50 = vadd.f32 %v537_v35, %v535_v45  ;;  %v549_v51 = vmul.f32 %v1624_v8, %v547_v42 }
  0x7c   : > { %s1947_s22 = sld [smem:[#allocation2 + $0x502]]  ;;  %v555_v52 = vmul.f32 %v1631_v12, %v553_v44  ;;  %1073 = vst.msk [vmem:[%s1686_s30 + $0x60] sm:$0xff] %vm355_vm0, %v527_v46  ;;  %v528_v53 = vadd.f32 %v526_v32, %v522_v47  ;;  %v628_v54 = vstv %s1879_s26  ;;  %v632_v55 = vstv %s1884_s7  ;;  %s789_s26 = sshll.u32 %s1686_s30, 4  ;;  %s1981_s26 = int_to_ptr.vmem [resolvable:$true] %s789_s26 }
  0x7d   : > { %s1951_s14 = sld [smem:[#allocation2 + $0x503]]  ;;  %v636_v56 = vstv %s1890_s8  ;;  %v550_v57 = vadd.f32 %v548_v37, %v544_v38  ;;  %v545_v58 = vadd.f32 %v543_v49, %v539_v50  ;;  %v629_v59 = vmul.f32 %v628_v54, %v1609_v0  ;;  %s791_s7 = sshll.u32 %s1956_s13, 4  ;;  %s1983_s7 = int_to_ptr.hbm [resolvable:$true] %s791_s7 }
  0x7e   : > { %v637_v60 = vmul.f32 %v1615_v2, %v636_v56  ;;  %1074 = vst.msk [vmem:[%s1686_s30 + $0x68] sm:$0xff] %vm355_vm0, %v528_v53  ;;  %v642_v61 = vstv %s1897_s9  ;;  %v648_v62 = vstv %s1924_s19  ;;  %v630_v63 = vmul.f32 %v628_v54, %v1611_v1  ;;  %s765_s8 = scalar_lea.sflag [#allocation4], %s1601_s25  ;;  %s1347_s9 = sshra.s32 %s1983_s7, 4  ;;  %s1348_s9 = int_to_ptr.hbm [resolvable:$true] %s1347_s9 }
  0x7f   : > { %v638_v3 = vmul.f32 %v1622_v7, %v636_v56  ;;  %v556_v5 = vadd.f32 %v554_v48, %v550_v57  ;;  %v551_v6 = vadd.f32 %v549_v51, %v545_v58  ;;  %v633_v9 = vadd.f32 %v632_v55, %v629_v59  ;;  %s1349_s0 = scalar_lea.hbm %s1348_s9, 128  ;;  %p1354_p10 = scmp.lt.s32.totalorder %s1348_s9, %s2092_s3 }
  0x80   : > { %v643_v11 = vmul.f32 %v1619_v4, %v642_v61  ;;  %v649_v13 = vmul.f32 %v1629_v10, %v648_v62  ;;  %v634_v14 = vadd.f32 %v632_v55, %v630_v63  ;;  %v644_v15 = vmul.f32 %v1624_v8, %v642_v61  ;;  %p1350_p4 = scmp.ne.s32.totalorder %s1348_s9, %s1349_s0  ;;  %p1355_p1 = scmp.lt.s32.totalorder %s1353_s11, %s1349_s0 }
  0x81   : > { %v650_v16 = vmul.f32 %v1631_v12, %v648_v62  ;;  %1080 = vst.msk [vmem:[%s1686_s30 + $0x70] sm:$0xff] %vm355_vm0, %v556_v5  ;;  %v557_v17 = vadd.f32 %v555_v52, %v551_v6  ;;  %v639_v18 = vadd.f32 %v637_v60, %v633_v9  ;;  %v696_v19 = vstv %s1931_s20 }
  0x82   : > { %v700_v20 = vstv %s1935_s6  ;;  %v640_v22 = vadd.f32 %v638_v3, %v634_v14  ;;  %v697_v23 = vmul.f32 %v696_v19, %v1609_v0  ;;  %v704_v24 = vstv %s1943_s15  ;;  %p1351_p6 = pnand %p1350_p4, %p1570_p2  ;;  %p1356_p3 = por %p1355_p1, %p1354_p10 }
  0x83   : > { %v710_v26 = vstv %s1947_s22  ;;  %1081 = vst.msk [vmem:[%s1686_s30 + $0x78] sm:$0xff] %vm355_vm0, %v557_v17  ;;  %v645_v27 = vadd.f32 %v643_v11, %v639_v18  ;;  %v705_v21 = vmul.f32 %v1615_v2, %v704_v24  ;;  %v716_v28 = vstv %s1951_s14 }
  0x84   : > { %v646_v29 = vadd.f32 %v644_v15, %v640_v22  ;;  %v701_v30 = vadd.f32 %v700_v20, %v697_v23  ;;  %v711_v31 = vmul.f32 %v1619_v4, %v710_v26  ;;  %v698_v32 = vmul.f32 %v696_v19, %v1611_v1  ;;  %p1352_p8 = pneg %p1351_p6 }
  0x86   : > { %p1357_p7 = pnand %p1356_p3, %p1352_p8 }
  0x88   : > { %1360 = shalt.err (!%p1357_p7)
}
  0x89   : > { %1134 = dma.vmem_to_hbm [thread:$0]  (%p1570_p2), %s1981_s26, 2048, %s1983_s7, %s765_s8, %s1461_s24, %s1461_s24, %s1462_s28   ;;  %v651_v0 = vadd.f32 %v649_v13, %v645_v27  ;;  %v717_v1 = vmul.f32 %v1629_v10, %v716_v28  ;;  %v706_v2 = vmul.f32 %v1622_v7, %v704_v24  ;;  %v652_v4 = vadd.f32 %v650_v16, %v646_v29 }
  0x8a   : > { %v707_v33 = vadd.f32 %v705_v21, %v701_v30  ;;  %v702_v25 = vadd.f32 %v700_v20, %v698_v32  ;;  %v712_v34 = vmul.f32 %v1624_v8, %v710_v26  ;;  %v718_v41 = vmul.f32 %v1631_v12, %v716_v28  ;;  %s1023_s20 = sshll.u32 %s1601_s25, 5  ;;  %s1123_s25 = sshll.u32 %s1447_s21, 5 }
  0x8b   : > { %v1094_v35 = vmul.f32 -1.442695, %v651_v0  ;;  %v1095_v36 = vmul.f32 -1.442695, %v652_v4  ;;  %s313_s6 = scalar_lea.vmem [#allocation12], %s1023_s20  ;;  %s826_s22 = scalar_lea.hbm %s2094_s5, %s1123_s25 }
  0x8c   : > { %v713_v39 = vadd.f32 %v711_v31, %v707_v33  ;;  %v708_v40 = vadd.f32 %v706_v2, %v702_v25  ;;  %s827_s21 = sshll.u32 %s313_s6, 4  ;;  %s829_s14 = sshll.u32 %s826_s22, 4  ;;  %s828_s21 = int_to_ptr.vmem [resolvable:$true] %s827_s21  ;;  %s830_s14 = int_to_ptr.hbm [resolvable:$true] %s829_s14 }
  0x8d   : > { %1229 = vpow2.f32 %v1094_v35  ;;  %s1375_s17 = sshra.s32 %s830_s14, 4  ;;  %s1381_s7 = scalar_lea.hbm %s2094_s5, 64  ;;  %s1376_s17 = int_to_ptr.hbm [resolvable:$true] %s1375_s17 }
  0x8e   : > { %1231 = vpow2.f32 %v1095_v36  ;;  %v719_v42 = vadd.f32 %v717_v1, %v713_v39  ;;  %v714_v43 = vadd.f32 %v712_v34, %v708_v40  ;;  %s1377_s29 = scalar_lea.hbm %s1376_s17, 32  ;;  %p1382_p0 = scmp.lt.s32.totalorder %s1376_s17, %s2094_s5 }
  0x8f   : > { %p1378_p11 = scmp.ne.s32.totalorder %s1376_s17, %s1377_s29  ;;  %p1383_p4 = scmp.lt.s32.totalorder %s1381_s7, %s1377_s29 }
  0x90   : > { %v1103_v37 = vmul.f32 -1.442695, %v719_v42  ;;  %v720_v44 = vadd.f32 %v718_v41, %v714_v43 }
  0x91   : > { %p1379_p12 = pnand %p1378_p11, %p1570_p2  ;;  %p1384_p6 = por %p1383_p4, %p1382_p0 }
  0x92   : > { %1233 = vpow2.f32 %v1103_v37  ;;  %v1104_v10 = vmul.f32 -1.442695, %v720_v44 }
  0x93   : > { %v1230_v7 = vpop.eup %1229  ;;  %p1380_p13 = pneg %p1379_p12 }
  0x94   : > { %v1232_v45 = vpop.eup %1231  ;;  %v659_v46 = vadd.f32 1.0, %v1230_v7  ;;  %1235 = vpow2.f32 %v1104_v10 }
  0x95   : > { %v660_v47 = vadd.f32 1.0, %v1232_v45  ;;  %p1385_p8 = pnand %p1384_p6, %p1380_p13 }
  0x96   : > { %1237 = vrcp.f32 %v659_v46  ;;  %v670_v52 = vand.u32 2147483647, %v659_v46  ;;  %v672_v53 = vand.u32 2147483648, %v659_v46  ;;  %vm666_vm9 = vweird.f32 %v659_v46 }
  0x97   : > { %1239 = vrcp.f32 %v660_v47  ;;  %v685_v55 = vand.u32 2147483647, %v660_v47  ;;  %v687_v57 = vand.u32 2147483648, %v660_v47  ;;  %vm681_vm11 = vweird.f32 %v660_v47 }
  0x98   : > { %v1234_v8 = vpop.eup %1233  ;;  %vm2015_vm13 = vcmp.eq.f32.partialorder %v670_v52, 8.507059e+37  ;;  %v673_v3 = vor.u32 1.1754944e-38, %v672_v53 }
  0x99   : > { %v727_v48 = vadd.f32 1.0, %v1234_v8  ;;  %vm2023_vm15 = vcmp.eq.f32.partialorder %v685_v55, 8.507059e+37  ;;  %v688_v14 = vor.u32 1.1754944e-38, %v687_v57 }
  0x9a   : > { %v1236_v49 = vpop.eup %1235 }
  0x9b   : > { %1241 = vrcp.f32 %v727_v48  ;;  %v728_v38 = vadd.f32 1.0, %v1236_v49  ;;  %v740_v59 = vand.u32 2147483648, %v727_v48  ;;  %vm734_vm2 = vweird.f32 %v727_v48 }
  0x9c   : > { %v1238_v12 = vpop.eup %1237  ;;  %v738_v15 = vand.u32 2147483647, %v727_v48 }
  0x9d   : > { %v1240_v50 = vpop.eup %1239  ;;  %v662_v51 = vmul.f32 %v1238_v12, %v659_v46  ;;  %1243 = vrcp.f32 %v728_v38  ;;  %vm667_vm10 = vweird.f32 %v1238_v12  ;;  %v741_v19 = vor.u32 1.1754944e-38, %v740_v59 }
  0x9e   : > { %v677_v54 = vmul.f32 %v1240_v50, %v660_v47  ;;  %vm682_vm12 = vweird.f32 %v1240_v50  ;;  %vm2019_vm14 = vmor %vm666_vm9, %vm667_vm10  ;;  %vm749_vm4 = vweird.f32 %v728_v38  ;;  %v753_v23 = vand.u32 2147483647, %v728_v38 }
  0x9f   : > { %v663_v56 = vsub.f32 1.0, %v662_v51  ;;  %vm2028_vm1 = vmor %vm681_vm11, %vm682_vm12  ;;  %v755_v21 = vand.u32 2147483648, %v728_v38  ;;  %vm739_vm7 = vcmp.eq.f32.partialorder %v738_v15, 8.507059e+37 }
  0xa0   : > { %v678_v58 = vsub.f32 1.0, %v677_v54  ;;  %vm754_vm9 = vcmp.eq.f32.partialorder %v753_v23, 8.507059e+37 }
  0xa1   : > { %v1242_v60 = vpop.eup %1241  ;;  %v664_v61 = vmul.f32 %v1238_v12, %v663_v56  ;;  %v756_v2 = vor.u32 1.1754944e-38, %v755_v21 }
  0xa2   : > { %v679_v5 = vmul.f32 %v1240_v50, %v678_v58  ;;  %v730_v9 = vmul.f32 %v1242_v60, %v727_v48  ;;  %vm735_vm3 = vweird.f32 %v1242_v60 }
  0xa3   : > { %v665_v11 = vadd.f32 %v1238_v12, %v664_v61  ;;  %v1244_v16 = vpop.eup %1243  ;;  %vm736_vm5 = vmor %vm734_vm2, %vm735_vm3 }
  0xa4   : > { %v680_v17 = vadd.f32 %v1240_v50, %v679_v5  ;;  %v731_v18 = vsub.f32 1.0, %v730_v9  ;;  %v745_v22 = vmul.f32 %v1244_v16, %v728_v38  ;;  %vm750_vm6 = vweird.f32 %v1244_v16 }
  0xa5   : > { %v669_v20 = vsel %vm2019_vm14, %v1238_v12, %v665_v11  ;;  %vm751_vm8 = vmor %vm749_vm4, %vm750_vm6 }
  0xa6   : > { %v674_v24 = vsel %vm2015_vm13, %v673_v3, %v669_v20  ;;  %v684_v26 = vsel %vm2028_vm1, %v1240_v50, %v680_v17  ;;  %v732_v27 = vmul.f32 %v1242_v60, %v731_v18  ;;  %v746_v30 = vsub.f32 1.0, %v745_v22 }
  0xa7   : > { %v1096_v28 = vadd.f32 -0.5, %v674_v24  ;;  %v689_v29 = vsel %vm2023_vm15, %v688_v14, %v684_v26 }
  0xa8   : > { %v1097_v31 = vadd.f32 -0.5, %v689_v29  ;;  %v733_v32 = vadd.f32 %v1242_v60, %v732_v27  ;;  %v747_v0 = vmul.f32 %v1244_v16, %v746_v30 }
  0xa9   : > { %693 = vst.msk [vmem:[%s313_s6] sm:$0xff] %vm355_vm0, %v1096_v28 }
  0xaa   : > { %694 = vst.msk [vmem:[%s313_s6 + $0x8] sm:$0xff] %vm355_vm0, %v1097_v31  ;;  %v737_v1 = vsel %vm736_vm5, %v1242_v60, %v733_v32  ;;  %v748_v33 = vadd.f32 %v1244_v16, %v747_v0 }
  0xab   : > { %v742_v4 = vsel %vm739_vm7, %v741_v19, %v737_v1 }
  0xac   : > { %v1105_v25 = vadd.f32 -0.5, %v742_v4  ;;  %v752_v34 = vsel %vm751_vm8, %v1244_v16, %v748_v33 }
  0xad   : > { %v757_v35 = vsel %vm754_vm9, %v756_v2, %v752_v34 }
  0xae   : > { %1107 = vst.msk [vmem:[%s313_s6 + $0x10] sm:$0xff] %vm355_vm0, %v1105_v25  ;;  %v1106_v36 = vadd.f32 -0.5, %v757_v35 }
  0xb0   : > { %1108 = vst.msk [vmem:[%s313_s6 + $0x18] sm:$0xff] %vm355_vm0, %v1106_v36 }
  0xb1   : > { %1388 = shalt.err (!%p1385_p8)
}
  0xb2   : > { %1136 = dma.vmem_to_hbm [thread:$0]  (%p1570_p2), %s828_s21, 512, %s830_s14, %s1903_s10, %s1461_s24, %s1461_s24, %s1462_s28  }
  0xb3 PF: > { %s844_s0 = sand.u32 1, %s1435_s18   ;;  %p1152_p10 = pnand %p1013_p9, %p1539_p5 }
  0xb4   : > { %s845_s1 = scalar_lea.sflag [#allocation4], %s844_s0 }
  0xb5   : > { %p1153_p1 = pneg %p1152_p10 }
  0xb7   : > { %1426 = dma.done.wait (%p1153_p1), %s845_s1, 2048  }
  0xb8   : > { %1428 = vsyncadd (%p1153_p1), %s845_s1, 4294965248  ;;  %s2135_s30 = sadd.s32 4294967294, %s1455_s23  }
  0xb9   : > { %s854_s16 = sand.u32 1, %s2135_s30  }
  0xba   : > { %s855_s11 = scalar_lea.sflag [#allocation11], %s854_s16 }
  0xbb   : > { %1430 = dma.done.wait (%p1153_p1), %s855_s11, 768  }
  0xbc   : > { %1432 = vsyncadd (%p1153_p1), %s855_s11, 4294966528  ;;  %s27_s23 = sadd.s32 1, %s1455_s23   ;;  %s2136_s18 = sld [smem:[#allocation18_spill]] }
  0xbd   : > { %p24_p2 = scmp.ge.s32.totalorder %s27_s23, 4   ;;  %s2137_s19 = sld [smem:[#allocation19_spill]] }
  0xbe   : > { %s2138_s20 = sld [smem:[#allocation22_spill]] }
  0xbf   : > { %s2139_s21 = sld [smem:[#allocation20_spill]]  ;;  %26 = sbr.rel (!%p24_p2) target bundleno = 14 (0xe), region = 129 }
  0xc0   : > { %s2140_s22 = sld [smem:[#allocation21_spill]] }
  0xc4   :  { %871 = vsyncpa [#allocation3], 1 }
  0xc5   :  { %873 = vsyncpa [#allocation3 + $0x1], 1 }
  0xc6   :  { %874 = vsyncpa [#allocation4], 1 }
  0xc7   :  { %876 = vsyncpa [#allocation4 + $0x1], 1 }
  0xc8   :  { %877 = vsyncpa [#allocation11], 1 }
  0xc9   :  { %879 = vsyncpa [#allocation11 + $0x1], 1 }
  0xca   :  { %880 = vsyncpa [#allocation5], 1 }
  0xcb   :  { %882 = vsyncpa [#allocation5 + $0x1], 1 }
  0xcc   :  { %883 = vsyncpa [#allocation7], 1 }

</bundles_post_ra>
